<compile_context>
chip_gen: v7x
topology: tpu7x:2x2x1
jax: 0.10.0
libtpu: 0.0.40
codegen_flags: <defaults>
</compile_context>

<pallas_src>
import jax
import jax.numpy as jnp
from jax.experimental import pallas as pl
from jax.experimental.pallas import tpu as pltpu


def _round_up(n, m):
    return (n + m - 1) // m * m


def _cdiv(a, b):
    return (a + b - 1) // b


def policy_net_kernel(x_ref, w1_ref, w2_ref, w3_ref, b_ref, out_ref):
    h_pad = w1_ref.shape[1]        # lane-padded hidden width
    out_sz = w3_ref.shape[1]       # natural output width

    b = b_ref[...]                 # [3, max(h_pad, out_sz)] f32, single DMA
    b1 = b[0:1, :h_pad]
    b2 = b[1:2, :h_pad]
    b3 = b[2:3, :out_sz]

    x = x_ref[...]                 # [tb, input_size] bf16

    # fc1 + ReLU (bf16 MXU, f32 accumulate; padded hidden lanes stay 0)
    h1 = jnp.dot(x, w1_ref[...], preferred_element_type=jnp.float32)
    h1 = jnp.maximum(h1 + b1, 0.0)

    # fc2 + ReLU
    h2 = jnp.dot(h1.astype(jnp.bfloat16), w2_ref[...],
                 preferred_element_type=jnp.float32)
    h2 = jnp.maximum(h2 + b2, 0.0)

    # fc3 (natural output width -> no class masking required)
    logits = jnp.dot(h2.astype(jnp.bfloat16), w3_ref[...],
                     preferred_element_type=jnp.float32) + b3

    # numerically stable softmax over the last axis, f32 throughout
    m = jnp.max(logits, axis=-1, keepdims=True)
    e = jnp.exp(logits - m)
    s = jnp.sum(e, axis=-1, keepdims=True)
    r = pl.reciprocal(s, approx=True)
    r = r * (2.0 - s * r)          # one Newton step -> ~f32-accurate divide
    out_ref[...] = (e * r).astype(out_ref.dtype)


def prepare_policy_net_params(w1, b1, w2, b2, w3, b3):
    """Pad / cast / pack the parameters ONCE (call at init, reuse per step)."""
    input_size, hidden_size = w1.shape
    output_size = w3.shape[1]
    h = _round_up(hidden_size, 128)          # lane-padded hidden dim
    bw = max(h, output_size)                 # packed-bias width
    bf16 = jnp.bfloat16

    w1p = jnp.zeros((input_size, h), bf16).at[:, :hidden_size].set(
        w1.astype(bf16))
    w2p = jnp.zeros((h, h), bf16).at[:hidden_size, :hidden_size].set(
        w2.astype(bf16))
    w3p = jnp.zeros((h, output_size), bf16).at[:hidden_size, :].set(
        w3.astype(bf16))

    # Pack the three biases into one f32 array (one DMA instead of three).
    bias = jnp.zeros((3, bw), jnp.float32)
    bias = bias.at[0, :hidden_size].set(b1.reshape(-1))
    bias = bias.at[1, :hidden_size].set(b2.reshape(-1))
    bias = bias.at[2, :output_size].set(b3.reshape(-1))

    return dict(w1=w1p, w2=w2p, w3=w3p, bias=bias,
                input_size=input_size, hidden_size=hidden_size,
                output_size=output_size)


def _choose_batch_tiling(B, tile_b):
    # >=2 even grid steps when there is enough batch to split (v7x megacore +
    # DMA/compute overlap); tile rows are multiples of 16 (bf16 sublanes) and
    # sized so the last tile is not mostly padding.
    n = max(1, _cdiv(B, tile_b))
    if B > 16:
        n = max(n, 2)
        if n % 2:
            n += 1
    tb = _round_up(_cdiv(B, n), 16)
    b_pad = _round_up(B, tb)
    return tb, b_pad, b_pad // tb


def policy_net_forward(x, params, *, tile_b=512):
    B = x.shape[0]
    input_size = params["input_size"]
    output_size = params["output_size"]
    w1p, w2p, w3p, bias = params["w1"], params["w2"], params["w3"], params["bias"]
    h = w1p.shape[1]
    bw = bias.shape[1]

    tb, b_pad, n_tiles = _choose_batch_tiling(B, tile_b)

    # Per-call work touches ONLY x: cast to bf16 and pad the batch dim.
    xp = jnp.zeros((b_pad, input_size), jnp.bfloat16)
    xp = xp.at[:B, :].set(x.astype(jnp.bfloat16))

    flops = 2 * b_pad * (input_size * h + h * h + h * output_size)
    transcendentals = b_pad * (output_size + 1)          # exp + reciprocal
    bytes_accessed = (2 * (xp.size + w1p.size + w2p.size + w3p.size)
                      + 4 * bias.size + 4 * b_pad * output_size)

    # TODO(synk): for very large hidden sizes on v7x (64 MiB VMEM), single-
    # buffer the resident weights and/or add an "arbitrary" K-tiling grid axis
    # with an f32 VMEM accumulator instead of whole-weight residency.
    out_padded = pl.pallas_call(
        policy_net_kernel,
        out_shape=jax.ShapeDtypeStruct((b_pad, output_size), jnp.float32),
        grid=(n_tiles,),
        in_specs=[
            # x: streamed over the batch axis at natural feature width
            # (block last dim == full array dim), auto double-buffered.
            pl.BlockSpec((tb, input_size), lambda i: (i, 0)),
            # weights + packed bias: same block every step -> VMEM-resident.
            pl.BlockSpec((input_size, h), lambda i: (0, 0)),
            pl.BlockSpec((h, h), lambda i: (0, 0)),
            pl.BlockSpec((h, output_size), lambda i: (0, 0)),
            pl.BlockSpec((3, bw), lambda i: (0, 0)),
        ],
        # output at natural class width -> no 16x HBM write inflation.
        out_specs=pl.BlockSpec((tb, output_size), lambda i: (i, 0)),
        compiler_params=pltpu.CompilerParams(
            dimension_semantics=("parallel",),
            vmem_limit_bytes=48 * 1024 * 1024),
        cost_estimate=pl.CostEstimate(
            flops=flops,
            transcendentals=transcendentals,
            bytes_accessed=bytes_accessed),
    )(xp, w1p, w2p, w3p, bias)

    # Strip batch padding (class dim is already natural width).
    return out_padded[:B]


def init_linear_params(key, in_features, out_features):
    # nn.Linear default init: U(-1/sqrt(fan_in), 1/sqrt(fan_in)).
    kw, kb = jax.random.split(key)
    bound = 1.0 / jnp.sqrt(jnp.float32(in_features))
    # Stored as [in, out] (transposed vs. PyTorch's [out, in]) for x @ W.
    w = jax.random.uniform(kw, (in_features, out_features), jnp.float32,
                           minval=-bound, maxval=bound)
    b = jax.random.uniform(kb, (1, out_features), jnp.float32,
                           minval=-bound, maxval=bound)
    return w, b


def reference_forward(x, w1, b1, w2, b2, w3, b3):
    h1 = jnp.maximum(x @ w1 + b1, 0.0)
    h2 = jnp.maximum(h1 @ w2 + b2, 0.0)
    logits = h2 @ w3 + b3
    return jax.nn.softmax(logits, axis=-1)


if __name__ == "__main__":
    input_size, hidden_size, output_size = 16, 32, 8
    batch = 2

    key = jax.random.PRNGKey(0)
    kx, k1, k2, k3 = jax.random.split(key, 4)

    x = jax.random.normal(kx, (batch, input_size), jnp.float32)
    w1, b1 = init_linear_params(k1, input_size, hidden_size)
    w2, b2 = init_linear_params(k2, hidden_size, hidden_size)
    w3, b3 = init_linear_params(k3, hidden_size, output_size)

    # Pad/pack/cast the parameters once; reuse for every forward call.
    params = prepare_policy_net_params(w1, b1, w2, b2, w3, b3)

    out = policy_net_forward(x, params)
    out = jax.block_until_ready(out)

    ref = reference_forward(x, w1, b1, w2, b2, w3, b3)
    assert out.shape == (batch, output_size)
    # Tolerance reflects bf16 matmul operands (f32 accumulation); the softmax
    # divide itself is Newton-refined to ~f32 accuracy.
    assert jnp.allclose(out, ref, atol=2e-2, rtol=2e-2)
    assert jnp.allclose(jnp.sum(out, axis=-1), 1.0, atol=1e-3)

    print("KERNEL_OK")
</pallas_src>

<mosaic_0001>
module attributes {stable_mosaic.version = 11 : i64} {
  func.func @policy_net_kernel(%arg0: i32, %arg1: memref<16x16xbf16, #tpu.memory_space<vmem>>, %arg2: memref<16x128xbf16, #tpu.memory_space<vmem>>, %arg3: memref<128x128xbf16, #tpu.memory_space<vmem>>, %arg4: memref<128x8xbf16, #tpu.memory_space<vmem>>, %arg5: memref<3x128xf32, #tpu.memory_space<vmem>>, %arg6: memref<16x8xf32, #tpu.memory_space<vmem>>) attributes {dimension_semantics = [#tpu.dimension_semantics<parallel>], iteration_bounds = array<i64: 1>, scalar_prefetch = 0 : i64, scratch_operands = 0 : i64, tpu.core_type = #tpu.core_type<tc>, window_params = [{transform_indices = @transform_0, window_bounds = array<i64: 16, 16>}, {pipeline_mode = #tpu.pipeline_mode<synchronous>, transform_indices = @transform_1, window_bounds = array<i64: 16, 128>}, {pipeline_mode = #tpu.pipeline_mode<synchronous>, transform_indices = @transform_2, window_bounds = array<i64: 128, 128>}, {pipeline_mode = #tpu.pipeline_mode<synchronous>, transform_indices = @transform_3, window_bounds = array<i64: 128, 8>}, {pipeline_mode = #tpu.pipeline_mode<synchronous>, transform_indices = @transform_4, window_bounds = array<i64: 3, 128>}, {transform_indices = @transform_5, window_bounds = array<i64: 16, 8>}]} {
    %c0 = arith.constant 0 : index
    %c0_0 = arith.constant 0 : index
    %0 = vector.load %arg5[%c0, %c0_0] : memref<3x128xf32, #tpu.memory_space<vmem>>, vector<3x128xf32>
    %1 = vector.extract_strided_slice %0 {offsets = [0, 0], sizes = [1, 128], strides = [1, 1]} : vector<3x128xf32> to vector<1x128xf32>
    %2 = vector.extract_strided_slice %0 {offsets = [1, 0], sizes = [1, 128], strides = [1, 1]} : vector<3x128xf32> to vector<1x128xf32>
    %3 = vector.extract_strided_slice %0 {offsets = [2, 0], sizes = [1, 8], strides = [1, 1]} : vector<3x128xf32> to vector<1x8xf32>
    %c0_1 = arith.constant 0 : index
    %c0_2 = arith.constant 0 : index
    %4 = vector.load %arg1[%c0_1, %c0_2] : memref<16x16xbf16, #tpu.memory_space<vmem>>, vector<16x16xbf16>
    %c0_3 = arith.constant 0 : index
    %c0_4 = arith.constant 0 : index
    %5 = vector.load %arg2[%c0_3, %c0_4] : memref<16x128xbf16, #tpu.memory_space<vmem>>, vector<16x128xbf16>
    %cst = arith.constant dense<0.000000e+00> : vector<16x128xf32>
    %6 = tpu.matmul %4, %5, %cst {dimension_numbers = #tpu.dot_dimension_numbers<[1], [0], [0], [1], [0, 0, 1, 1], [], []>} : vector<16x16xbf16>, vector<16x128xbf16>, vector<16x128xf32> -> vector<16x128xf32>
    %7 = vector.broadcast %1 : vector<1x128xf32> to vector<16x128xf32>
    %8 = arith.addf %6, %7 : vector<16x128xf32>
    %cst_5 = arith.constant 0.000000e+00 : f32
    %9 = vector.broadcast %cst_5 : f32 to vector<16x128xf32>
    %10 = arith.maximumf %8, %9 : vector<16x128xf32>
    %11 = arith.truncf %10 : vector<16x128xf32> to vector<16x128xbf16>
    %c0_6 = arith.constant 0 : index
    %c0_7 = arith.constant 0 : index
    %12 = vector.load %arg3[%c0_6, %c0_7] : memref<128x128xbf16, #tpu.memory_space<vmem>>, vector<128x128xbf16>
    %cst_8 = arith.constant dense<0.000000e+00> : vector<16x128xf32>
    %13 = tpu.matmul %11, %12, %cst_8 {dimension_numbers = #tpu.dot_dimension_numbers<[1], [0], [0], [1], [0, 0, 1, 1], [], []>} : vector<16x128xbf16>, vector<128x128xbf16>, vector<16x128xf32> -> vector<16x128xf32>
    %14 = vector.broadcast %2 : vector<1x128xf32> to vector<16x128xf32>
    %15 = arith.addf %13, %14 : vector<16x128xf32>
    %cst_9 = arith.constant 0.000000e+00 : f32
    %16 = vector.broadcast %cst_9 : f32 to vector<16x128xf32>
    %17 = arith.maximumf %15, %16 : vector<16x128xf32>
    %18 = arith.truncf %17 : vector<16x128xf32> to vector<16x128xbf16>
    %c0_10 = arith.constant 0 : index
    %c0_11 = arith.constant 0 : index
    %19 = vector.load %arg4[%c0_10, %c0_11] : memref<128x8xbf16, #tpu.memory_space<vmem>>, vector<128x8xbf16>
    %cst_12 = arith.constant dense<0.000000e+00> : vector<16x8xf32>
    %20 = tpu.matmul %18, %19, %cst_12 {dimension_numbers = #tpu.dot_dimension_numbers<[1], [0], [0], [1], [0, 0, 1, 1], [], []>} : vector<16x128xbf16>, vector<128x8xbf16>, vector<16x8xf32> -> vector<16x8xf32>
    %21 = vector.broadcast %3 : vector<1x8xf32> to vector<16x8xf32>
    %22 = arith.addf %20, %21 : vector<16x8xf32>
    %cst_13 = arith.constant dense<0xFF800000> : vector<16xf32>
    %23 = vector.multi_reduction <maximumf>, %22, %cst_13 [1] : vector<16x8xf32> to vector<16xf32>
    %24 = vector.shape_cast %23 : vector<16xf32> to vector<16x1xf32>
    %25 = vector.broadcast %24 : vector<16x1xf32> to vector<16x8xf32>
    %26 = arith.subf %22, %25 : vector<16x8xf32>
    %27 = math.exp %26 : vector<16x8xf32>
    %cst_14 = arith.constant dense<0.000000e+00> : vector<16xf32>
    %28 = vector.multi_reduction <add>, %27, %cst_14 [1] : vector<16x8xf32> to vector<16xf32>
    %29 = vector.shape_cast %28 : vector<16xf32> to vector<16x1xf32>
    %30 = tpu.reciprocal %29 {approx = true} : vector<16x1xf32> -> vector<16x1xf32>
    %31 = arith.mulf %29, %30 : vector<16x1xf32>
    %cst_15 = arith.constant 2.000000e+00 : f32
    %32 = vector.broadcast %cst_15 : f32 to vector<16x1xf32>
    %33 = arith.subf %32, %31 : vector<16x1xf32>
    %34 = arith.mulf %30, %33 : vector<16x1xf32>
    %35 = vector.broadcast %34 : vector<16x1xf32> to vector<16x8xf32>
    %36 = arith.mulf %27, %35 : vector<16x8xf32>
    %c0_16 = arith.constant 0 : index
    %c0_17 = arith.constant 0 : index
    %37 = vector.load %arg6[%c0_16, %c0_17] : memref<16x8xf32, #tpu.memory_space<vmem>>, vector<16x8xf32>
    tpu.vector_store %arg6[%c0_16, %c0_17], %36 {strides = array<i32>} : memref<16x8xf32, #tpu.memory_space<vmem>>, vector<16x8xf32>,
    return
  }
  func.func @transform_0(%arg0: i32) -> (i32, i32) {
    %c0_i32 = arith.constant 0 : i32
    %c0_i32_0 = arith.constant 0 : i32
    return %arg0, %c0_i32 : i32, i32
  }
  func.func @transform_1(%arg0: i32) -> (i32, i32) {
    %c0_i32 = arith.constant 0 : i32
    %c0_i32_0 = arith.constant 0 : i32
    %c0_i32_1 = arith.constant 0 : i32
    return %c0_i32, %c0_i32_0 : i32, i32
  }
  func.func @transform_2(%arg0: i32) -> (i32, i32) {
    %c0_i32 = arith.constant 0 : i32
    %c0_i32_0 = arith.constant 0 : i32
    %c0_i32_1 = arith.constant 0 : i32
    return %c0_i32, %c0_i32_0 : i32, i32
  }
  func.func @transform_3(%arg0: i32) -> (i32, i32) {
    %c0_i32 = arith.constant 0 : i32
    %c0_i32_0 = arith.constant 0 : i32
    %c0_i32_1 = arith.constant 0 : i32
    return %c0_i32, %c0_i32_0 : i32, i32
  }
  func.func @transform_4(%arg0: i32) -> (i32, i32) {
    %c0_i32 = arith.constant 0 : i32
    %c0_i32_0 = arith.constant 0 : i32
    %c0_i32_1 = arith.constant 0 : i32
    return %c0_i32, %c0_i32_0 : i32, i32
  }
  func.func @transform_5(%arg0: i32) -> (i32, i32) {
    %c0_i32 = arith.constant 0 : i32
    %c0_i32_0 = arith.constant 0 : i32
    return %arg0, %c0_i32 : i32, i32
  }
}

</mosaic_0001>

<bundles_post_ra>
// kernel: tpu_custom_call.1
= control target key start
LH: loop header
LB: loop body
LE: loop exit
PB: predicated region body
PF: predicated region fallthrough
CT: control target
= control target key end

     0   :  { %10 = vsyncpa [#allocation3], 0  ;;  %s500_s18 = smov [#allocation2]   ;;  %s633_s0 = inlined_call_operand.vmem [shape: bf16[16,16], index: 0, kind: input, shape index: {}]   ;;  %s634_s1 = inlined_call_operand.hbm [shape: bf16[16,128], index: 1, kind: input, shape index: {}]   ;;  %s635_s2 = inlined_call_operand.vmem [shape: bf16[128,128], index: 2, kind: input, shape index: {}]   ;;  %s636_s3 = inlined_call_operand.vmem [shape: bf16[128,8], index: 3, kind: input, shape index: {}]   ;;  %s637_s4 = inlined_call_operand.vmem [shape: f32[3,128], index: 4, kind: input, shape index: {}]   ;;  %s638_s5 = inlined_call_operand.vmem [shape: f32[16,8], index: 5, kind: output, shape index: {}]  }
   0x1   :  { %s18_s19 = sshll.u32 %s500_s18, 4  ;;  %s476_s22 = scalar_lea.hbm %s634_s1, 128  ;;  %s19_s19 = int_to_ptr.vmem [resolvable:$true] %s18_s19 }
   0x2   :  { %p477_p0 = scmp.ne.s32.totalorder %s634_s1, %s476_s22  ;;  %p480_p1 = scmp.lt.u32.totalorder %s476_s22, %s634_s1 }
   0x4   :  { %p482_p2 = pnand %p480_p1, %p477_p0 }
   0x6   :  { %485 = shalt.err (!%p482_p2)
}
   0x7   :  { %s486_s27 = scalar_lea.vmem %s19_s19, 128  ;;  %p491_p4 = scmp.lt.s32.totalorder %s19_s19, %s19_s19 }
   0x8   :  { %p487_p3 = scmp.ne.s32.totalorder %s19_s19, %s486_s27  ;;  %p492_p5 = scmp.lt.s32.totalorder %s486_s27, %s486_s27 }
   0xa   :  { %p493_p6 = por %p492_p5, %p491_p4 }
   0xc   :  { %p494_p7 = pnand %p493_p6, %p487_p3 }
   0xe   :  { %497 = shalt.err (!%p494_p7)
}
   0xf   :  { %s501_s28 = smov 64   ;;  %s502_s29 = smov 4  }
  0x10   :  { %24 = dma.hbm_to_vmem [thread:$0]  %s634_s1, 128, %s19_s19, [#allocation3], %s501_s28, %s501_s28, %s502_s29  }
  0x11   :  { %498 = dma.done.wait [#allocation3], 128  }
  0x12   :  { %499 = vsyncadd [#allocation3], 4294967168  ;;  %v503_v0 = vmov 0.0   ;;  %vm504_vm0 = vmmov 0   ;;  %v450_v1 = vld [vmem:[#allocation2] sm:$0xff]   ;;  %vm55_vm1 = vcmask 130048   ;;  %v40_v17 = vlaneseq }
  0x13   :  { %399 = vmatprep.subr.bf16.mxu0 %v503_v0  ;;  %401 = vmatprep.mubr.msk.bf16.mxu0 %vm504_vm0, %v503_v0  ;;  %v451_v2 = vld [vmem:[%s633_s0] sm:$0xff]   ;;  %v453_v4 = vld [vmem:[%s635_s2 + $0x8] sm:$0xff]   ;;  %v454_v5 = vld [vmem:[%s635_s2 + $0x10] sm:$0xff]   ;;  %vm324_vm2 = vcmask 64512  }
  0x14   :  { %405 = vmatprep.subr.bf16.mxu1 %v503_v0  ;;  %421 = vmatprep.mubr.msk.bf16.mxu1 %vm504_vm0, %v503_v0  ;;  %v452_v3 = vld [vmem:[%s635_s2] sm:$0xff]   ;;  %v455_v6 = vld [vmem:[%s635_s2 + $0x18] sm:$0xff]   ;;  %v457_v8 = vld [vmem:[%s635_s2 + $0x28] sm:$0xff]   ;;  %v41_v18 = vshrl.u32 %v40_v17, 7 }
  0x15   :  { %400 = vmatpush3.bf16.msra.mxu0 %v450_v1  ;;  %406 = vmatpush3.bf16.msra.mxu1 %v452_v3  ;;  %v456_v7 = vld [vmem:[%s635_s2 + $0x20] sm:$0xff]   ;;  %v458_v9 = vld [vmem:[%s635_s2 + $0x30] sm:$0xff]   ;;  %v459_v10 = vld [vmem:[%s635_s2 + $0x38] sm:$0xff]  }
  0x16   :  { %425 = vmatprep.subr.bf16.mxu0 %v503_v0  ;;  %407 = vmatprep.subr.bf16.mxu1 %v503_v0  ;;  %v460_v11 = vld [vmem:[%s636_s3] sm:$0xff]   ;;  %v461_v12 = vld [vmem:[%s636_s3 + $0x8] sm:$0xff]   ;;  %v462_v13 = vld [vmem:[%s636_s3 + $0x10] sm:$0xff]   ;;  %v42_v19 = vsub.s32 0, %v41_v18  ;;  %v121_v33 = vsub.s32 1, %v41_v18  ;;  %v233_v44 = vsub.s32 2, %v41_v18 }
  0x17   :  { %v463_v14 = vld [vmem:[%s636_s3 + $0x18] sm:$0xff]   ;;  %v464_v15 = vld [vmem:[%s636_s3 + $0x20] sm:$0xff]   ;;  %v465_v16 = vld [vmem:[%s636_s3 + $0x28] sm:$0xff]  }
  0x18   :  { %402 = vmatmul.mubr.msk.bf16.vlgmr.msra.gmra.mrb[0].mxu0 %vm55_vm1, %v451_v2  ;;  %v35_v20 = vld [vmem:[%s637_s4] sm:$0x7]  ;;  %v466_v31 = vld [vmem:[%s636_s3 + $0x30] sm:$0xff]   ;;  %v467_v32 = vld [vmem:[%s636_s3 + $0x38] sm:$0xff]  }
  0x19   :  { %441 = vmatprep.mubr.msk.bf16.mxu0 %vm504_vm0, %v503_v0  ;;  %408 = vmatpush3.bf16.msra.mxu1 %v453_v4  ;;  %v43_v21 = vrot.slane %v35_v20, %v42_v19  ;;  %v122_v34 = vrot.slane %v35_v20, %v121_v33  ;;  %v234_v45 = vrot.slane %v35_v20, %v233_v44 }
  0x1a   :  { %409 = vmatprep.subr.bf16.mxu1 %v503_v0  ;;  %426 = vmatpush3.bf16.msra.mxu0 %v460_v11 }
  0x1b   :  { %427 = vmatprep.subr.bf16.mxu0 %v503_v0 }
  0x1d   :  { %410 = vmatpush3.bf16.msra.mxu1 %v454_v5 }
  0x1e   :  { %411 = vmatprep.subr.bf16.mxu1 %v503_v0  ;;  %428 = vmatpush3.bf16.msra.mxu0 %v461_v12 }
  0x1f   :  { %429 = vmatprep.subr.bf16.mxu0 %v503_v0 }
  0x21   :  { %412 = vmatpush3.bf16.msra.mxu1 %v455_v6 }
  0x22   :  { %413 = vmatprep.subr.bf16.mxu1 %v503_v0  ;;  %430 = vmatpush3.bf16.msra.mxu0 %v462_v13 }
  0x23   :  { %431 = vmatprep.subr.bf16.mxu0 %v503_v0 }
  0x25   :  { %414 = vmatpush3.bf16.msra.mxu1 %v456_v7 }
  0x26   :  { %415 = vmatprep.subr.bf16.mxu1 %v503_v0  ;;  %432 = vmatpush3.bf16.msra.mxu0 %v463_v14 }
  0x27   :  { %433 = vmatprep.subr.bf16.mxu0 %v503_v0 }
  0x29   :  { %416 = vmatpush3.bf16.msra.mxu1 %v457_v8 }
  0x2a   :  { %417 = vmatprep.subr.bf16.mxu1 %v503_v0  ;;  %434 = vmatpush3.bf16.msra.mxu0 %v464_v15 }
  0x2b   :  { %435 = vmatprep.subr.bf16.mxu0 %v503_v0 }
  0x2d   :  { %418 = vmatpush3.bf16.msra.mxu1 %v458_v9 }
  0x2e   :  { %419 = vmatprep.subr.bf16.mxu1 %v503_v0  ;;  %436 = vmatpush3.bf16.msra.mxu0 %v465_v16 }
  0x2f   :  { %437 = vmatprep.subr.bf16.mxu0 %v503_v0 }
  0x31   :  { %420 = vmatpush3.bf16.msra.mxu1 %v459_v10 }
  0x32   :  { %438 = vmatpush3.bf16.msra.mxu0 %v466_v31 }
  0x33   :  { %439 = vmatprep.subr.bf16.mxu0 %v503_v0 }
  0x36   :  { %440 = vmatpush3.bf16.msra.mxu0 %v467_v32 }
  0xeb   :  { %v93_v22 = vpop.f32.mrb[0].mxu0 }
  0xec   :  { %v94_v23 = vadd.f32 %v93_v22, %v43_v21  ;;  %v403_v24 = vpop.f32.mrb[1].mxu0 }
  0xed   :  { %v96_v25 = vpop.f32.mrb[2].mxu0 }
  0xee   :  { %v97_v26 = vadd.f32 %v96_v25, %v43_v21  ;;  %v404_v27 = vpop.f32.mrb[3].mxu0  ;;  %v100_v28 = vmax.f32 %v94_v23, 0.0 }
  0xf0   :  { %v101_v29 = vmax.f32 %v97_v26, 0.0 }
  0xf2   :  { %v102_v30 = vpack.c.bf16 %v101_v29, %v100_v28 }
  0xf4   :  { %422 = vmatmul.mubr.bf16.vlgmr.msra.gmra.mrb[0].mxu1 %v102_v30 }
 0x1c7   :  { %v205_v35 = vpop.f32.mrb[0].mxu1 }
 0x1c8   :  { %v206_v36 = vadd.f32 %v205_v35, %v122_v34  ;;  %v423_v37 = vpop.f32.mrb[1].mxu1 }
 0x1c9   :  { %v208_v38 = vpop.f32.mrb[2].mxu1 }
 0x1ca   :  { %v209_v39 = vadd.f32 %v208_v38, %v122_v34  ;;  %v424_v40 = vpop.f32.mrb[3].mxu1  ;;  %v212_v41 = vmax.f32 %v206_v36, 0.0 }
 0x1cc   :  { %v213_v42 = vmax.f32 %v209_v39, 0.0 }
 0x1ce   :  { %v214_v43 = vpack.c.bf16 %v213_v42, %v212_v41 }
 0x1d0   :  { %442 = vmatmul.mubr.bf16.vlgmr.msra.gmra.mrb[4].mxu0 %v214_v43 }
 0x2a3   :  { %v317_v46 = vpop.f32.mrb[4].mxu0 }
 0x2a4   :  { %v318_v47 = vadd.f32 %v317_v46, %v234_v45  ;;  %v443_v48 = vpop.f32.mrb[5].mxu0 }
 0x2a5   :  { %v320_v49 = vpop.f32.mrb[6].mxu0 }
 0x2a6   :  { %v321_v50 = vadd.f32 %v320_v49, %v234_v45  ;;  %v444_v51 = vpop.f32.mrb[7].mxu0  ;;  %v325_v52 = vsel %vm324_vm2, %v318_v47, -inf }
 0x2a7   :  { %326 = vmax.xlane.f32.xlu0 %v325_v52 }
 0x2a8   :  { %v328_v53 = vsel %vm324_vm2, %v321_v50, -inf }
 0x2ab   :  { %329 = vmax.xlane.f32.xlu0 %v328_v53 }
 0x334   :  { %v327_v54 = vpop.xlane.xlu0 %326 }
 0x335   :  { %v331_v55 = vsub.f32 %v318_v47, %v327_v54 }
 0x337   :  { %v333_v56 = vmul.f32 1.442695, %v331_v55 }
 0x338   :  { %v330_v57 = vpop.xlane.xlu0 %329 }
 0x339   :  { %468 = vpow2.f32 %v333_v56  ;;  %v332_v58 = vsub.f32 %v321_v50, %v330_v57 }
 0x33b   :  { %v335_v59 = vmul.f32 1.442695, %v332_v58 }
 0x33d   :  { %470 = vpow2.f32 %v335_v59 }
 0x343   :  { %v469_v60 = vpop.eup %468 }
 0x344   :  { %v337_v61 = vsel %vm324_vm2, %v469_v60, 0.0 }
 0x345   :  { %338 = vadd.xlane.f32.xlu1 %v337_v61 }
 0x347   :  { %v471_v62 = vpop.eup %470 }
 0x348   :  { %v340_v63 = vsel %vm324_vm2, %v471_v62, 0.0 }
 0x349   :  { %341 = vadd.xlane.f32.xlu1 %v340_v63 }
 0x3d2   :  { %v339_v0 = vpop.xlane.xlu1 %338 }
 0x3d3   :  { %472 = vrcp.f32 %v339_v0 }
 0x3d6   :  { %v342_v1 = vpop.xlane.xlu1 %341 }
 0x3d7   :  { %474 = vrcp.f32 %v342_v1 }
 0x3dd   :  { %v473_v2 = vpop.eup %472 }
 0x3de   :  { %v345_v3 = vmul.f32 %v473_v2, %v339_v0 }
 0x3e0   :  { %v347_v4 = vsub.f32 2.0, %v345_v3 }
 0x3e1   :  { %v475_v5 = vpop.eup %474 }
 0x3e2   :  { %v349_v6 = vmul.f32 %v473_v2, %v347_v4  ;;  %v346_v7 = vmul.f32 %v475_v5, %v342_v1 }
 0x3e4   :  { %v351_v8 = vmul.f32 %v469_v60, %v349_v6  ;;  %v348_v9 = vsub.f32 2.0, %v346_v7 }
 0x3e6   :  { %353 = vst.msk [vmem:[%s638_s5] sm:$0xff] %vm324_vm2, %v351_v8  ;;  %v350_v10 = vmul.f32 %v475_v5, %v348_v9 }
 0x3e8   :  { %v352_v11 = vmul.f32 %v471_v62, %v350_v10 }
 0x3ea   :  { %354 = vst.msk [vmem:[%s638_s5 + $0x8] sm:$0xff] %vm324_vm2, %v352_v11 }
 0x3eb   :  { %359 = vsyncpa [#allocation3], 1 }

</bundles_post_ra>
